<compile_context>
chip_gen: v7x
topology: tpu7x:2x2x1
jax: 0.10.0
libtpu: 0.0.40
codegen_flags: <defaults>
</compile_context>

<pallas_src>
import functools
import numpy as np
import jax
import jax.numpy as jnp
from jax.experimental import pallas as pl
from jax.experimental.pallas import tpu as pltpu


def _round_up(x, m):
    return ((int(x) + m - 1) // m) * m


# -----------------------------------------------------------------------------
# Kernel 1: fused Linear + activation, row-tiled
# -----------------------------------------------------------------------------
def _linear_act_kernel(x_ref, w_ref, b_ref, o_ref, *, act):
    y = jnp.dot(x_ref[...].astype(jnp.bfloat16), w_ref[...],
                preferred_element_type=jnp.float32) + b_ref[...]
    if act == "leaky_relu":
        y = jnp.where(y > 0, y, 0.01 * y)
    o_ref[...] = y


def linear_act(x, w, b, act="none", row_tile=512):
    n, fi = x.shape
    fo = w.shape[1]
    rt = min(row_tile, _round_up(n, 8))
    n_pad = _round_up(n, rt)
    xp = jnp.pad(x, ((0, n_pad - n), (0, 0))) if n_pad != n else x
    out = pl.pallas_call(
        functools.partial(_linear_act_kernel, act=act),
        out_shape=jax.ShapeDtypeStruct((n_pad, fo), jnp.float32),
        grid=(n_pad // rt,),
        in_specs=[pl.BlockSpec((rt, fi), lambda i: (i, 0)),
                  pl.BlockSpec((fi, fo), lambda i: (0, 0)),
                  pl.BlockSpec((1, fo), lambda i: (0, 0))],
        out_specs=pl.BlockSpec((rt, fo), lambda i: (i, 0)),
        compiler_params=pltpu.CompilerParams(dimension_semantics=("parallel",)),
    )(xp, w.astype(jnp.bfloat16), b)
    return out[:n]


# -----------------------------------------------------------------------------
# Kernel 2: one nn.TransformerEncoderLayer (batch_first, post-norm, ReLU FFN)
# -----------------------------------------------------------------------------
def _layer_norm(x, g, b, eps=1e-5):
    mean = jnp.mean(x, axis=-1, keepdims=True)
    var = jnp.mean((x - mean) ** 2, axis=-1, keepdims=True)
    return (x - mean) * jax.lax.rsqrt(var + eps) * g + b


def _encoder_layer_kernel(x_ref, mask_ref, wqkv_ref, bqkv_ref, wo_ref, bo_ref,
                          ln1g_ref, ln1b_ref, w1_ref, b1_ref, w2_ref, b2_ref,
                          ln2g_ref, ln2b_ref, o_ref, *, n_head):
    x = x_ref[...]                                   # (BB, L, D) f32
    BB, L, D = x.shape
    H = n_head
    dh = D // H
    scale = 1.0 / (dh ** 0.5)
    bf16 = jnp.bfloat16

    # ---- fused per-head QKV projection; heads folded onto the batch axis ----
    xb = x.astype(bf16)
    x_rep = jnp.broadcast_to(xb[:, None], (BB, H, L, D)).reshape(BB * H, L, D)
    w_rep = jnp.broadcast_to(wqkv_ref[...][None], (BB, H, D, 3 * dh)).reshape(BB * H, D, 3 * dh)
    qkv = jax.lax.dot_general(x_rep, w_rep, (((2,), (1,)), ((0,), (0,))),
                              preferred_element_type=jnp.float32)
    b_rep = jnp.broadcast_to(bqkv_ref[...][None], (BB, H, 1, 3 * dh)).reshape(BB * H, 1, 3 * dh)
    qkv = qkv + b_rep                                # (BB*H, L, 3*dh)
    q = qkv[:, :, 0:dh]
    k = qkv[:, :, dh:2 * dh]
    v = qkv[:, :, 2 * dh:3 * dh]

    # ---- scaled dot-product attention, all (batch, head) pairs in one batched matmul ----
    s = jax.lax.dot_general(q.astype(bf16), k.astype(bf16),
                            (((2,), (2,)), ((0,), (0,))),
                            preferred_element_type=jnp.float32) * scale    # (BB*H, L, L)
    kmask = mask_ref[...]                            # (BB, 1, L); 1.0 = valid key
    neg = jnp.where(kmask > 0.5, 0.0, -1e30)
    neg_rep = jnp.broadcast_to(neg[:, None], (BB, H, 1, L)).reshape(BB * H, 1, L)
    s = s + neg_rep
    s = s - jnp.max(s, axis=-1, keepdims=True)
    p = jnp.exp(s)
    p = p / jnp.sum(p, axis=-1, keepdims=True)
    o = jax.lax.dot_general(p.astype(bf16), v.astype(bf16),
                            (((2,), (1,)), ((0,), (0,))),
                            preferred_element_type=jnp.float32)            # (BB*H, L, dh)

    # ---- output projection: per-head partial projections, summed over heads ----
    wo_rep = jnp.broadcast_to(wo_ref[...][None], (BB, H, dh, D)).reshape(BB * H, dh, D)
    oh = jax.lax.dot_general(o.astype(bf16), wo_rep, (((2,), (1,)), ((0,), (0,))),
                             preferred_element_type=jnp.float32)           # (BB*H, L, D)
    oh4 = oh.reshape(BB, H, L, D)
    attn = oh4[:, 0]
    for h in range(1, H):
        attn = attn + oh4[:, h]
    attn = attn + bo_ref[...]                        # (BB, L, D)

    # ---- post-norm residual + ReLU FFN ----
    x1 = _layer_norm(x + attn, ln1g_ref[...], ln1b_ref[...])               # (BB, L, D)
    x1f = x1.reshape(BB * L, D)
    ff = jnp.dot(x1f.astype(bf16), w1_ref[...],
                 preferred_element_type=jnp.float32) + b1_ref[...]
    ff = jnp.maximum(ff, 0.0)
    ff = jnp.dot(ff.astype(bf16), w2_ref[...],
                 preferred_element_type=jnp.float32) + b2_ref[...]
    x2 = _layer_norm(x1f + ff, ln2g_ref[...], ln2b_ref[...])
    o_ref[...] = x2.reshape(BB, L, D)


def run_encoder_layer(x, mask_f, p, n_head, batch_block=8):
    B, L, D = x.shape
    FF = p["w1"].shape[1]
    H, dh = n_head, D // n_head
    BB = min(batch_block, B)
    B_pad = _round_up(B, BB)
    if B_pad != B:
        x = jnp.pad(x, ((0, B_pad - B), (0, 0), (0, 0)))
        mask_f = jnp.pad(mask_f, ((0, B_pad - B), (0, 0), (0, 0)))

    bf16 = jnp.bfloat16
    # fused per-head QKV weight (H, D, 3*dh) and bias (H, 1, 3*dh); bf16 matmul operands
    per_head = lambda w: w.reshape(D, H, dh).transpose(1, 0, 2)
    wqkv = jnp.concatenate([per_head(p["wq"]), per_head(p["wk"]), per_head(p["wv"])],
                           axis=-1).astype(bf16)
    bqkv = jnp.concatenate([p["bq"].reshape(H, dh), p["bk"].reshape(H, dh),
                            p["bv"].reshape(H, dh)], axis=-1)[:, None, :]
    wo = p["wo"].reshape(H, dh, D).astype(bf16)

    b3 = lambda shp: pl.BlockSpec(shp, lambda b: (b, 0, 0))
    full2 = lambda shp: pl.BlockSpec(shp, lambda b: (0, 0))
    full3 = lambda shp: pl.BlockSpec(shp, lambda b: (0, 0, 0))
    in_specs = [
        b3((BB, L, D)),                 # x
        b3((BB, 1, L)),                 # key-padding mask
        full3((H, D, 3 * dh)),          # fused QKV weight (bf16)
        full3((H, 1, 3 * dh)),          # fused QKV bias
        full3((H, dh, D)),              # out-proj weight per head (bf16)
        full2((1, D)),                  # out-proj bias
        full2((1, D)), full2((1, D)),   # ln1
        full2((D, FF)), full2((1, FF)), # ffn1 (weight bf16)
        full2((FF, D)), full2((1, D)),  # ffn2 (weight bf16)
        full2((1, D)), full2((1, D)),   # ln2
    ]
    out = pl.pallas_call(
        functools.partial(_encoder_layer_kernel, n_head=n_head),
        out_shape=jax.ShapeDtypeStruct((B_pad, L, D), jnp.float32),
        grid=(B_pad // BB,),
        in_specs=in_specs,
        out_specs=b3((BB, L, D)),
        compiler_params=pltpu.CompilerParams(dimension_semantics=("parallel",)),
    )(x, mask_f, wqkv, bqkv, wo, p["bo"], p["ln1_g"], p["ln1_b"],
      p["w1"].astype(bf16), p["b1"], p["w2"].astype(bf16), p["b2"],
      p["ln2_g"], p["ln2_b"])
    return out[:B]


# -----------------------------------------------------------------------------
# Kernel 3: mixture-density pair block (GM_SV / GM_SV_V2 style), tiled over Np
# -----------------------------------------------------------------------------
def _mdn_kernel(pep_ref, proT_ref, ppos_ref, qposT_ref, pn2_ref, qn2_ref,
                w_pep_ref, b_fold_ref, w_proT_ref, whT_ref, bh_ref,
                pi_ref, sg_ref, mu_ref, d_ref, *, n_gaussians):
    G = n_gaussians
    bf16 = jnp.bfloat16
    pep = pep_ref[0]                     # (Lp, D)  f32
    proT = proT_ref[0]                   # (D, tnp) f32 (protein transposed, pair axis on lanes)
    Lp, D = pep.shape
    tnp = proT.shape[1]
    Gp3 = whT_ref.shape[0]

    # pair MLP (eval-mode BatchNorm folded into the weights outside the kernel):
    #   h3[i, f, j] = hp[i, f] + hqT[f, j]
    hp = jnp.dot(pep.astype(bf16), w_pep_ref[...],
                 preferred_element_type=jnp.float32) + b_fold_ref[...]       # (Lp, D)
    hqT = jnp.dot(w_proT_ref[...], proT.astype(bf16),
                  preferred_element_type=jnp.float32)                        # (D, tnp)
    h3 = hp[:, :, None] + hqT[None, :, :]                                    # (Lp, D, tnp)
    h3 = jnp.where(h3 > 0, h3, jnp.expm1(h3))                                # ELU

    # fused pi/sigma/mu head: one batched matmul, pair axis stays lane-dense
    wh_rep = jnp.broadcast_to(whT_ref[...][None], (Lp, Gp3, D))
    raw = jax.lax.dot_general(wh_rep, h3.astype(bf16),
                              (((2,), (1,)), ((0,), (0,))),
                              preferred_element_type=jnp.float32) + bh_ref[...]   # (Lp, Gp3, tnp)

    # pi: stable softmax over the G mixture channels (static unroll over sublane rows)
    logits = raw[:, 0:G, :]
    m = logits[:, 0:1, :]
    for c in range(1, G):
        m = jnp.maximum(m, logits[:, c:c + 1, :])
    e = jnp.exp(logits - m)
    tot = e[:, 0:1, :]
    for c in range(1, G):
        tot = tot + e[:, c:c + 1, :]
    pi_ref[0] = e / tot

    sg = raw[:, G:2 * G, :]
    sg_ref[0] = jnp.where(sg > 0, sg, jnp.expm1(sg)) + 1.1
    mu = raw[:, 2 * G:3 * G, :]
    mu_ref[0] = jnp.where(mu > 0, mu, jnp.expm1(mu)) + 1.0

    # pairwise |p_i - q_j| via the gram-matrix identity (one small matmul, lane-dense)
    cross = jnp.dot(ppos_ref[0], qposT_ref[0], preferred_element_type=jnp.float32)  # (Lp, tnp)
    d2 = pn2_ref[0] + qn2_ref[0] - 2.0 * cross
    d_ref[0] = jnp.sqrt(jnp.maximum(d2, 0.0))


def run_mdn(pep_h, pro_h, pep_pos, pro_pos, g, n_gaussians):
    B, Lp, D = pep_h.shape
    Np = pro_h.shape[1]
    G = n_gaussians
    Gp3 = _round_up(3 * G, 8)                  # fused head channels, padded for sublanes
    tnp = 256 if Np > 128 else 128             # protein tile (lane axis); bounds VMEM per step
    Np_pad = _round_up(Np, tnp)
    PP = 8                                     # xyz padded to 8 lanes
    bf16 = jnp.bfloat16

    # ---- fold eval-mode BatchNorm into the pair-MLP weights (outside the kernel) ----
    s = g["bn_g"][0] * jax.lax.rsqrt(g["bn_var"][0] + 1e-5)          # (D,)
    t = g["bn_b"][0] - g["bn_mean"][0] * s
    w_pep = (g["w_pep"] * s[None, :]).astype(bf16)                   # (D, D)
    w_proT = (g["w_pro"] * s[None, :]).T.astype(bf16)                # (D, D) transposed
    b_fold = (g["b_mlp"][0] * s + t)[None, :]                        # (1, D)

    # ---- fuse pi/sigma/mu heads into one transposed (Gp3, D) weight ----
    wh = jnp.concatenate([g["w_pi"], g["w_sigma"], g["w_mu"]], axis=1)       # (D, 3G)
    whT = jnp.pad(wh, ((0, 0), (0, Gp3 - 3 * G))).T.astype(bf16)             # (Gp3, D)
    bh = jnp.concatenate([g["b_pi"], g["b_sigma"], g["b_mu"]], axis=1)[0]
    bh = jnp.pad(bh, (0, Gp3 - 3 * G))[None, :, None]                        # (1, Gp3, 1)

    # ---- transpose / pad protein-side tensors so the pair axis is lane-dense ----
    pro_hT = jnp.pad(jnp.swapaxes(pro_h, 1, 2), ((0, 0), (0, 0), (0, Np_pad - Np)))
    pep_posP = jnp.pad(pep_pos, ((0, 0), (0, 0), (0, PP - pep_pos.shape[2])))
    pro_posT = jnp.pad(jnp.swapaxes(pro_pos, 1, 2),
                       ((0, 0), (0, PP - pro_pos.shape[2]), (0, Np_pad - Np)))
    pep_n2 = jnp.sum(pep_posP * pep_posP, axis=2, keepdims=True)             # (B, Lp, 1)
    pro_n2 = jnp.sum(pro_posT * pro_posT, axis=1, keepdims=True)             # (B, 1, Np_pad)

    grid = (B, Np_pad // tnp)
    in_specs = [
        pl.BlockSpec((1, Lp, D), lambda b, j: (b, 0, 0)),        # pep_h
        pl.BlockSpec((1, D, tnp), lambda b, j: (b, 0, j)),       # pro_hT
        pl.BlockSpec((1, Lp, PP), lambda b, j: (b, 0, 0)),       # pep_pos
        pl.BlockSpec((1, PP, tnp), lambda b, j: (b, 0, j)),      # pro_posT
        pl.BlockSpec((1, Lp, 1), lambda b, j: (b, 0, 0)),        # |pep|^2
        pl.BlockSpec((1, 1, tnp), lambda b, j: (b, 0, j)),       # |pro|^2
        pl.BlockSpec((D, D), lambda b, j: (0, 0)),               # w_pep (bf16, BN-folded)
        pl.BlockSpec((1, D), lambda b, j: (0, 0)),               # folded bias
        pl.BlockSpec((D, D), lambda b, j: (0, 0)),               # w_proT (bf16, BN-folded)
        pl.BlockSpec((Gp3, D), lambda b, j: (0, 0)),             # fused head weight (bf16)
        pl.BlockSpec((1, Gp3, 1), lambda b, j: (0, 0, 0)),       # fused head bias
    ]
    out_shape = (
        jax.ShapeDtypeStruct((B, Lp, G, Np_pad), jnp.float32),   # pi   (pair axis last)
        jax.ShapeDtypeStruct((B, Lp, G, Np_pad), jnp.float32),   # sigma
        jax.ShapeDtypeStruct((B, Lp, G, Np_pad), jnp.float32),   # mu
        jax.ShapeDtypeStruct((B, Lp, Np_pad), jnp.float32),      # dist
    )
    out_specs = (
        pl.BlockSpec((1, Lp, G, tnp), lambda b, j: (b, 0, 0, j)),
        pl.BlockSpec((1, Lp, G, tnp), lambda b, j: (b, 0, 0, j)),
        pl.BlockSpec((1, Lp, G, tnp), lambda b, j: (b, 0, 0, j)),
        pl.BlockSpec((1, Lp, tnp), lambda b, j: (b, 0, j)),
    )
    pi, sg, mu, dist = pl.pallas_call(
        functools.partial(_mdn_kernel, n_gaussians=G),
        grid=grid, in_specs=in_specs, out_specs=out_specs, out_shape=out_shape,
        compiler_params=pltpu.CompilerParams(
            dimension_semantics=("parallel", "parallel"),
            vmem_limit_bytes=48 * 1024 * 1024),
    )(pep_h, pro_hT, pep_posP, pro_posT, pep_n2, pro_n2,
      w_pep, b_fold, w_proT, whT, bh)

    # back to the [B, Lp, Np, G] contract (outside the kernel)
    pi = jnp.transpose(pi[..., :Np], (0, 1, 3, 2))
    sg = jnp.transpose(sg[..., :Np], (0, 1, 3, 2))
    mu = jnp.transpose(mu[..., :Np], (0, 1, 3, 2))
    return pi, sg, mu, dist[..., :Np]


# -----------------------------------------------------------------------------
# Glue: to_dense_batch, parameter init, full forward
# -----------------------------------------------------------------------------
def to_dense(flat, batch_np, lengths, fill=0.0, pad_to=8):
    """torch_geometric.utils.to_dense_batch equivalent (static lengths, L padded to 8)."""
    B = len(lengths)
    Lmax = _round_up(int(max(lengths)), pad_to)
    pos = np.concatenate([np.arange(l) for l in lengths]).astype(np.int32)
    dense = jnp.full((B, Lmax) + tuple(flat.shape[1:]), fill, flat.dtype)
    dense = dense.at[np.asarray(batch_np), pos].set(flat)
    mask_np = np.zeros((B, Lmax), dtype=bool)
    for b, l in enumerate(lengths):
        mask_np[b, :l] = True
    return dense, jnp.asarray(mask_np)


def init_params(key, cfg):
    D = cfg["node_embed_size"]
    F = cfg["pep_in_feat_size"]
    FF = cfg["dim_feedforward"]
    G = cfg["n_gaussians"]
    keys = iter(jax.random.split(key, 256))

    def lin(fi, fo):
        w = jax.random.normal(next(keys), (fi, fo), jnp.float32) / np.sqrt(fi)
        b = jax.random.normal(next(keys), (1, fo), jnp.float32) * 0.01
        return w, b

    params = {}
    params["embed_w"], params["embed_b"] = lin(F, D)
    params["pro_w"], params["pro_b"] = lin(cfg["pro_node_in_s"] + 20, D)

    layers = []
    for _ in range(cfg["pep_encoder_n_layer"]):
        p = {}
        p["wq"], p["bq"] = lin(D, D)
        p["wk"], p["bk"] = lin(D, D)
        p["wv"], p["bv"] = lin(D, D)
        p["wo"], p["bo"] = lin(D, D)
        p["ln1_g"] = jnp.ones((1, D), jnp.float32)
        p["ln1_b"] = jnp.zeros((1, D), jnp.float32)
        p["w1"], p["b1"] = lin(D, FF)
        p["w2"], p["b2"] = lin(FF, D)
        p["ln2_g"] = jnp.ones((1, D), jnp.float32)
        p["ln2_b"] = jnp.zeros((1, D), jnp.float32)
        layers.append(p)
    params["encoder_layers"] = layers

    def gm():
        g = {}
        g["w_pep"], g["b_mlp"] = lin(D, D)
        g["w_pro"], _ = lin(D, D)
        g["bn_g"] = jnp.ones((1, D), jnp.float32)
        g["bn_b"] = jnp.zeros((1, D), jnp.float32)
        g["bn_mean"] = jnp.zeros((1, D), jnp.float32)
        g["bn_var"] = jnp.ones((1, D), jnp.float32)
        g["w_pi"], g["b_pi"] = lin(D, G)
        g["w_sigma"], g["b_sigma"] = lin(D, G)
        g["w_mu"], g["b_mu"] = lin(D, G)
        return g

    params["gm1"] = gm()
    params["gm2"] = gm()
    return params


def deep_ppi_score_forward(params, data, cfg):
    B = len(data["pep_lengths"])
    D = cfg["node_embed_size"]
    H = cfg["pep_encoder_n_head"]
    G = cfg["n_gaussians"]

    # ---- protein encoder (simplified GVP_embedding: scalar + seq-one-hot embed) ----
    # TODO(synk): full GVP_embedding (vector channels, edge features, message passing
    # over edge_index) is not reproduced; only the scalar node embedding path is kept.
    seq_oh = jax.nn.one_hot(data["pro_seq"], 20, dtype=jnp.float32)
    pro_in = jnp.concatenate([data["pro_node_s"], seq_oh], axis=-1)
    pro_s_flat = linear_act(pro_in, params["pro_w"], params["pro_b"], act="leaky_relu")

    # ---- peptide branch: to_dense_batch -> Linear+LeakyReLU -> TransformerEncoder ----
    pep_dense, pep_mask = to_dense(data["pep_node_s"], data["pep_batch"], data["pep_lengths"])
    Lp, F = pep_dense.shape[1], pep_dense.shape[2]
    x = linear_act(pep_dense.reshape(B * Lp, F), params["embed_w"], params["embed_b"],
                   act="leaky_relu").reshape(B, Lp, D)
    mask_f = pep_mask.astype(jnp.float32).reshape(B, 1, Lp)
    for lp in params["encoder_layers"]:
        x = run_encoder_layer(x, mask_f, lp, H)
    pep_h = x   # padded rows produce finite garbage; invalid pairs are masked downstream

    pro_h, _ = to_dense(pro_s_flat, data["pro_batch"], data["pro_lengths"])
    pep_pos, _ = to_dense(data["pep_X_cb"], data["pep_batch"], data["pep_lengths"])
    pro_pos, _ = to_dense(data["pro_X_cb"], data["pro_batch"], data["pro_lengths"])

    # ---- GM_SV / GM_SV_V2 mixture-density pair blocks ----
    pi1, sigma1, mu1, dist1 = run_mdn(pep_h, pro_h, pep_pos, pro_pos, params["gm1"], G)
    # TODO(synk): GM_SV_V2's internal distance source from `data` is unspecified in the
    # reference; we reuse the X_cb pairwise distances.
    pi2, sigma2, mu2, dist2 = run_mdn(pep_h, pro_h, pep_pos, pro_pos, params["gm2"], G)

    Np = pro_h.shape[1]
    batch_ids = jnp.broadcast_to(jnp.arange(B, dtype=jnp.int32)[:, None, None], (B, Lp, Np))
    return (pi1, sigma1, mu1, dist1, batch_ids, pi2, sigma2, mu2, dist2, batch_ids)


# -----------------------------------------------------------------------------
if __name__ == "__main__":
    cfg = dict(
        pep_in_feat_size=32,
        node_embed_size=32,
        pep_encoder_n_head=4,
        pep_encoder_n_layer=2,
        dim_feedforward=2048,     # nn.TransformerEncoderLayer default
        dropout_rate=0.1,         # eval mode => identity
        pro_node_in_s=6,
        pro_node_in_v=3,
        n_gaussians=10,
    )
    key = jax.random.PRNGKey(0)
    pkey, dkey = jax.random.split(key)
    params = init_params(pkey, cfg)

    pep_lengths = [8, 6]
    pro_lengths = [16, 12]
    n_pep, n_pro = sum(pep_lengths), sum(pro_lengths)
    dks = jax.random.split(dkey, 8)
    data = {
        "pep_node_s": jax.random.normal(dks[0], (n_pep, cfg["pep_in_feat_size"]), jnp.float32),
        "pep_X_cb": jax.random.normal(dks[1], (n_pep, 3), jnp.float32) * 5.0,
        "pep_lengths": pep_lengths,
        "pep_batch": np.repeat(np.arange(len(pep_lengths)), pep_lengths),
        "pro_node_s": jax.random.normal(dks[2], (n_pro, cfg["pro_node_in_s"]), jnp.float32),
        "pro_node_v": jax.random.normal(dks[3], (n_pro, cfg["pro_node_in_v"], 3), jnp.float32),
        "pro_seq": jax.random.randint(dks[4], (n_pro,), 0, 20),
        "pro_X_cb": jax.random.normal(dks[5], (n_pro, 3), jnp.float32) * 8.0,
        "pro_lengths": pro_lengths,
        "pro_batch": np.repeat(np.arange(len(pro_lengths)), pro_lengths),
    }

    outs = deep_ppi_score_forward(params, data, cfg)
    outs = jax.block_until_ready(outs)
    print("KERNEL_OK")
</pallas_src>

<mosaic_0001>
module attributes {stable_mosaic.version = 11 : i64} {
  func.func @_linear_act_kernel(%arg0: i32, %arg1: memref<32x26xf32, #tpu.memory_space<vmem>>, %arg2: memref<26x32xbf16, #tpu.memory_space<vmem>>, %arg3: memref<1x32xf32, #tpu.memory_space<vmem>>, %arg4: memref<32x32xf32, #tpu.memory_space<vmem>>) attributes {dimension_semantics = [#tpu.dimension_semantics<parallel>], iteration_bounds = array<i64: 1>, scalar_prefetch = 0 : i64, scratch_operands = 0 : i64, tpu.core_type = #tpu.core_type<tc>, window_params = [{transform_indices = @transform_0, window_bounds = array<i64: 32, 26>}, {pipeline_mode = #tpu.pipeline_mode<synchronous>, transform_indices = @transform_1, window_bounds = array<i64: 26, 32>}, {pipeline_mode = #tpu.pipeline_mode<synchronous>, transform_indices = @transform_2, window_bounds = array<i64: 1, 32>}, {transform_indices = @transform_3, window_bounds = array<i64: 32, 32>}]} {
    %c0 = arith.constant 0 : index
    %c0_0 = arith.constant 0 : index
    %0 = vector.load %arg1[%c0, %c0_0] : memref<32x26xf32, #tpu.memory_space<vmem>>, vector<32x26xf32>
    %1 = arith.truncf %0 : vector<32x26xf32> to vector<32x26xbf16>
    %c0_1 = arith.constant 0 : index
    %c0_2 = arith.constant 0 : index
    %2 = vector.load %arg2[%c0_1, %c0_2] : memref<26x32xbf16, #tpu.memory_space<vmem>>, vector<26x32xbf16>
    %cst = arith.constant dense<0.000000e+00> : vector<32x32xf32>
    %3 = tpu.matmul %1, %2, %cst {dimension_numbers = #tpu.dot_dimension_numbers<[1], [0], [0], [1], [0, 0, 1, 1], [], []>} : vector<32x26xbf16>, vector<26x32xbf16>, vector<32x32xf32> -> vector<32x32xf32>
    %c0_3 = arith.constant 0 : index
    %c0_4 = arith.constant 0 : index
    %4 = vector.load %arg3[%c0_3, %c0_4] : memref<1x32xf32, #tpu.memory_space<vmem>>, vector<1x32xf32>
    %5 = vector.broadcast %4 : vector<1x32xf32> to vector<32x32xf32>
    %6 = arith.addf %3, %5 : vector<32x32xf32>
    %cst_5 = arith.constant 0.000000e+00 : f32
    %7 = vector.broadcast %cst_5 : f32 to vector<32x32xf32>
    %8 = arith.cmpf ogt, %6, %7 : vector<32x32xf32>
    %cst_6 = arith.constant 0.00999999977 : f32
    %9 = vector.broadcast %cst_6 : f32 to vector<32x32xf32>
    %10 = arith.mulf %9, %6 : vector<32x32xf32>
    %11 = arith.select %8, %6, %10 : vector<32x32xi1>, vector<32x32xf32>
    %c0_7 = arith.constant 0 : index
    %c0_8 = arith.constant 0 : index
    %12 = vector.load %arg4[%c0_7, %c0_8] : memref<32x32xf32, #tpu.memory_space<vmem>>, vector<32x32xf32>
    tpu.vector_store %arg4[%c0_7, %c0_8], %11 {strides = array<i32>} : memref<32x32xf32, #tpu.memory_space<vmem>>, vector<32x32xf32>,
    return
  }
  func.func @transform_0(%arg0: i32) -> (i32, i32) {
    %c0_i32 = arith.constant 0 : i32
    %c0_i32_0 = arith.constant 0 : i32
    return %arg0, %c0_i32 : i32, i32
  }
  func.func @transform_1(%arg0: i32) -> (i32, i32) {
    %c0_i32 = arith.constant 0 : i32
    %c0_i32_0 = arith.constant 0 : i32
    %c0_i32_1 = arith.constant 0 : i32
    return %c0_i32, %c0_i32_0 : i32, i32
  }
  func.func @transform_2(%arg0: i32) -> (i32, i32) {
    %c0_i32 = arith.constant 0 : i32
    %c0_i32_0 = arith.constant 0 : i32
    %c0_i32_1 = arith.constant 0 : i32
    return %c0_i32, %c0_i32_0 : i32, i32
  }
  func.func @transform_3(%arg0: i32) -> (i32, i32) {
    %c0_i32 = arith.constant 0 : i32
    %c0_i32_0 = arith.constant 0 : i32
    return %arg0, %c0_i32 : i32, i32
  }
}

</mosaic_0001>

<bundles_post_ra>
// kernel: tpu_custom_call.1
= control target key start
LH: loop header
LB: loop body
LE: loop exit
PB: predicated region body
PF: predicated region fallthrough
CT: control target
= control target key end

     0   :  { %8 = vsyncpa [#allocation3], 0  ;;  %s342_s0 = inlined_call_operand.hbm [shape: f32[32,26], index: 0, kind: input, shape index: {}]   ;;  %s343_s1 = inlined_call_operand.hbm [shape: bf16[26,32], index: 1, kind: input, shape index: {}]   ;;  %s344_s2 = inlined_call_operand.vmem [shape: f32[1,32], index: 2, kind: input, shape index: {}]   ;;  %s345_s3 = inlined_call_operand.hbm [shape: f32[32,32], index: 3, kind: output, shape index: {}]  }
   0x1   :  { %9 = vsyncpa [#allocation6], 0 }
   0x2   :  { %10 = vsyncpa [#allocation4], 0  ;;  %s266_s12 = smov [#allocation2]   ;;  %s194_s16 = scalar_lea.hbm %s342_s0, 512 }
   0x3   :  { %s16_s13 = sshll.u32 %s266_s12, 4  ;;  %p195_p0 = scmp.ne.s32.totalorder %s342_s0, %s194_s16  ;;  %s17_s13 = int_to_ptr.vmem [resolvable:$true] %s16_s13 }
   0x4   :  { %p198_p1 = scmp.lt.u32.totalorder %s194_s16, %s342_s0 }
   0x6   :  { %p200_p2 = pnand %p198_p1, %p195_p0 }
   0x8   :  { %203 = shalt.err (!%p200_p2)
}
   0x9   :  { %s204_s21 = scalar_lea.vmem %s17_s13, 512  ;;  %p209_p4 = scmp.lt.s32.totalorder %s17_s13, %s17_s13 }
   0xa   :  { %p205_p3 = scmp.ne.s32.totalorder %s17_s13, %s204_s21  ;;  %p210_p5 = scmp.lt.s32.totalorder %s204_s21, %s204_s21 }
   0xc   :  { %p211_p6 = por %p210_p5, %p209_p4 }
   0xe   :  { %p212_p7 = pnand %p211_p6, %p205_p3 }
  0x10   :  { %215 = shalt.err (!%p212_p7)
}
  0x11   :  { %s267_s22 = smov 128   ;;  %s268_s23 = smov 8  }
  0x12   :  { %22 = dma.hbm_to_vmem [thread:$0]  %s342_s0, 512, %s17_s13, [#allocation3], %s267_s22, %s267_s22, %s268_s23  }
  0x13   :  { %s269_s26 = smov [#allocation5]   ;;  %s216_s30 = scalar_lea.hbm %s343_s1, 256 }
  0x14   :  { %s28_s27 = sshll.u32 %s269_s26, 4  ;;  %p217_p8 = scmp.ne.s32.totalorder %s343_s1, %s216_s30  ;;  %s29_s27 = int_to_ptr.vmem [resolvable:$true] %s28_s27 }
  0x15   :  { %p220_p9 = scmp.lt.u32.totalorder %s216_s30, %s343_s1 }
  0x17   :  { %p222_p10 = pnand %p220_p9, %p217_p8 }
  0x19   :  { %225 = shalt.err (!%p222_p10)
}
  0x1a   :  { %s226_s8 = scalar_lea.vmem %s29_s27, 256  ;;  %p231_p12 = scmp.lt.s32.totalorder %s29_s27, %s29_s27 }
  0x1b   :  { %p227_p11 = scmp.ne.s32.totalorder %s29_s27, %s226_s8  ;;  %p232_p13 = scmp.lt.s32.totalorder %s226_s8, %s226_s8 }
  0x1d   :  { %p233_p0 = por %p232_p13, %p231_p12 }
  0x1f   :  { %p234_p1 = pnand %p233_p0, %p227_p11 }
  0x21   :  { %237 = shalt.err (!%p234_p1)
}
  0x22   :  { %s270_s0 = smov 64   ;;  %s271_s9 = smov 4  }
  0x23   :  { %34 = dma.hbm_to_vmem [thread:$0]  %s343_s1, 256, %s29_s27, [#allocation6], %s270_s0, %s270_s0, %s271_s9  }
  0x24   :  { %260 = dma.done.wait [#allocation3], 512  }
  0x25   :  { %261 = vsyncadd [#allocation3], 4294966784 }
  0x26   :  { %262 = dma.done.wait [#allocation6], 256  }
  0x27   :  { %263 = vsyncadd [#allocation6], 4294967040  ;;  %v192_v0 = vld [vmem:[#allocation5] sm:$0xff]   ;;  %vm79_vm0 = vcmask 1044480   ;;  %v193_v1 = vld [vmem:[#allocation5 + $0x8] sm:$0x1f]  }
  0x28   :  { %176 = vmatprep.subr.bf16.mxu0 %v192_v0  ;;  %v44_v2 = vld [vmem:[#allocation2] sm:$0xff]  ;;  %v45_v3 = vld [vmem:[#allocation2 + $0x8] sm:$0xff]  ;;  %vm72_vm1 = vcmask 211968   ;;  %v46_v5 = vld [vmem:[#allocation2 + $0x10] sm:$0xff]  ;;  %v81_v7 = vsel %vm79_vm0, %v193_v1, 0  ;;  %vm144_vm3 = vcmask 261120  }
  0x29   :  { %177 = vmatpush3.bf16.msra.mxu0 %v192_v0  ;;  %v48_v4 = vpack.c.bf16 %v45_v3, %v44_v2  ;;  %v47_v6 = vld [vmem:[#allocation2 + $0x18] sm:$0xff]  ;;  %v167_v9 = vld [vmem:[%s344_s2] ss:$0 sm:$0xff]  ;;  %s272_s13 = smov [#allocation7]  }
  0x2a   :  { %184 = vmatprep.subr.msk.bf16.mxu0 %vm79_vm0, %v193_v1  ;;  %v49_v8 = vpack.c.bf16 %v47_v6, %v46_v5  ;;  %s154_s14 = sshll.u32 %s272_s13, 4  ;;  %s155_s14 = int_to_ptr.vmem [resolvable:$true] %s154_s14 }
  0x2b   :  { %180 = vmatprep.mubr.msk.bf16.mxu0 %vm72_vm1, %v48_v4  ;;  %s238_s2 = scalar_lea.vmem %s155_s14, 512  ;;  %p243_p3 = scmp.lt.s32.totalorder %s155_s14, %s155_s14 }
  0x2c   :  { %p239_p2 = scmp.ne.s32.totalorder %s155_s14, %s238_s2  ;;  %p244_p4 = scmp.lt.s32.totalorder %s238_s2, %s238_s2 }
  0x2d   :  { %179 = vmatpush3.bf16.msra.mxu0 %v81_v7 }
  0x2e   :  { %p245_p5 = por %p244_p4, %p243_p3 }
  0x30   :  { %181 = vmatmul.mubr.msk.bf16.vlgmr.msra.gmra.mrb[0].mxu0 %vm72_vm1, %v49_v8  ;;  %p246_p6 = pnand %p245_p5, %p239_p2 }
 0x103   :  { %v182_v10 = vpop.f32.mrb[0].mxu0 }
 0x104   :  { %v126_v11 = vadd.f32 %v182_v10, %v167_v9  ;;  %v117_v12 = vpop.f32.mrb[1].mxu0 }
 0x105   :  { %v118_v13 = vadd.f32 %v167_v9, %v117_v12  ;;  %v183_v14 = vpop.f32.mrb[2].mxu0 }
 0x106   :  { %vm134_vm2 = vcmp.gt.f32.partialorder %v126_v11, 0.0  ;;  %v138_v15 = vmul.f32 0.01, %v126_v11  ;;  %v129_v16 = vadd.f32 %v183_v14, %v167_v9  ;;  %v120_v17 = vpop.f32.mrb[3].mxu0 }
 0x107   :  { %vm132_vm4 = vcmp.gt.f32.partialorder %v118_v13, 0.0  ;;  %v136_v18 = vmul.f32 0.01, %v118_v13  ;;  %v121_v19 = vadd.f32 %v167_v9, %v120_v17 }
 0x108   :  { %v142_v20 = vsel %vm134_vm2, %v126_v11, %v138_v15  ;;  %vm135_vm5 = vcmp.gt.f32.partialorder %v129_v16, 0.0  ;;  %v139_v21 = vmul.f32 0.01, %v129_v16 }
 0x109   :  { %147 = vst.msk [vmem:[#allocation7 + $0x10] sm:$0xff] %vm144_vm3, %v142_v20  ;;  %v140_v22 = vsel %vm132_vm4, %v118_v13, %v136_v18  ;;  %vm133_vm6 = vcmp.gt.f32.partialorder %v121_v19, 0.0  ;;  %v137_v23 = vmul.f32 0.01, %v121_v19 }
 0x10a   :  { %145 = vst.msk [vmem:[#allocation7] sm:$0xff] %vm144_vm3, %v140_v22  ;;  %v143_v24 = vsel %vm135_vm5, %v129_v16, %v139_v21 }
 0x10b   :  { %148 = vst.msk [vmem:[#allocation7 + $0x18] sm:$0xff] %vm144_vm3, %v143_v24  ;;  %v141_v25 = vsel %vm133_vm6, %v121_v19, %v137_v23 }
 0x10c   :  { %146 = vst.msk [vmem:[#allocation7 + $0x8] sm:$0xff] %vm144_vm3, %v141_v25 }
 0x10d   :  { %249 = shalt.err (!%p246_p6)
}
 0x10e   :  { %s250_s17 = scalar_lea.hbm %s345_s3, 512 }
 0x10f   :  { %p251_p7 = scmp.ne.s32.totalorder %s345_s3, %s250_s17  ;;  %p254_p8 = scmp.lt.u32.totalorder %s250_s17, %s345_s3 }
 0x111   :  { %p256_p9 = pnand %p254_p8, %p251_p7 }
 0x113   :  { %259 = shalt.err (!%p256_p9)
}
 0x114   :  { %160 = dma.vmem_to_hbm [thread:$0]  %s155_s14, 512, %s345_s3, [#allocation4], %s267_s22, %s267_s22, %s268_s23  }
 0x115   :  { %264 = dma.done.wait [#allocation4], 512  }
 0x116   :  { %265 = vsyncadd [#allocation4], 4294966784 }
 0x117   :  { %164 = vsyncpa [#allocation3], 1 }
 0x118   :  { %165 = vsyncpa [#allocation6], 1 }
 0x119   :  { %166 = vsyncpa [#allocation4], 1 }

</bundles_post_ra>
